<compile_context>
chip_gen: v5e
topology: v5e:2x2
jax: 0.10.0
libtpu: 0.0.40
codegen_flags: <defaults>
</compile_context>

<pallas_src>
import functools

import jax
import jax.numpy as jnp
from jax import lax
from jax.experimental import pallas as pl
from jax.experimental.pallas import tpu as pltpu

KERNEL_SIZE = 3
DOT_DTYPE = jnp.bfloat16     # MXU operand dtype on the fast path (f32 accumulate)


# ------------------------------ TPU detection ----------------------------------

def _detect_tpu():
    """Returns (is_v5, two_tensorcores). Conservative defaults on failure."""
    try:
        kind = jax.devices()[0].device_kind.lower()
    except Exception:
        kind = ""
    is_v5 = "v5" in kind
    # v7x has 2 TensorCores per chip -> shard the batch across them.
    two_tc = ("v7" in kind) or ("7x" in kind)
    return is_v5, two_tc


# ------------------------- roll-convention probe --------------------------------

def _roll_probe_kernel(x_ref, o_ref):
    o_ref[...] = pltpu.roll(x_ref[...], 1, axis=1)


def _pltpu_roll_matches_jnp():
    """True iff pltpu.roll follows the jnp.roll convention out[i] = in[i-shift].

    One-vreg probe so the tap-shift direction is robust across Mosaic versions.
    Resolved eagerly (returns a Python bool)."""
    x = jnp.arange(8 * 128, dtype=jnp.float32).reshape(8, 128)
    y = pl.pallas_call(
        _roll_probe_kernel,
        out_shape=jax.ShapeDtypeStruct((8, 128), jnp.float32))(x)
    return bool(y[0, 1] == x[0, 0])


def _lane_roll(x, shift, roll_jnp):
    """out[..., i] = x[..., (i - shift) % N]  (jnp.roll convention)."""
    n = x.shape[-1]
    amt = shift % n if roll_jnp else (-shift) % n
    return pltpu.roll(x, amt, axis=1)


# --------------------------- fully-fused network kernel -------------------------

def _make_classifier_kernel(block_meta, T, roll_jnp):
    """block_meta: tuple of (dilations tuple, dot_dtype name, ew_in_dot bool)."""
    dot32 = functools.partial(jnp.dot, preferred_element_type=jnp.float32)
    n_blocks = len(block_meta)

    def kernel(*refs):
        x_ref = refs[0]
        scale_ref = refs[1 + 6 * n_blocks]     # folded BN*fc scale  (C, 1)
        const_ref = refs[2 + 6 * n_blocks]     # folded scalar       (1, 1)
        out_ref = refs[-1]

        bt = x_ref.shape[-1]
        # Per-lane time index within each sample (lane l = b*T + t).  Hoisted.
        t_idx = lax.broadcasted_iota(jnp.int32, (1, bt), 1) % T
        mask_cache = {}

        def tap_masks(d):                      # reuse masks across blocks
            if d not in mask_cache:
                mask_cache[d] = (t_idx >= d, t_idx < T - d)
            return mask_cache[d]

        x = x_ref[...]                         # (Cin, bt) f32
        for b, (dilations, dot_name, ew_in_dot) in enumerate(block_meta):
            base = 1 + 6 * b
            w0_ref, b0_ref, wfg_ref, bfg_ref, wc_ref, bc_ref = refs[base:base + 6]
            dot_dt = jnp.dtype(dot_name)
            co = w0_ref.shape[0]

            # Entry 1x1 conv (Cin -> Co), f32 accumulate.
            x = dot32(w0_ref[...], x.astype(dot_dt)) + b0_ref[...]
            res = x

            for i, d in enumerate(dilations):  # statically unrolled
                if ew_in_dot:
                    # Roll/select in the (bf16) dot dtype -> half the XLU/VPU
                    # traffic and live vregs (v6e/v7x only).
                    xc = x.astype(dot_dt)
                    if d < T:
                        pm, fm = tap_masks(d)
                        past = jnp.where(pm, _lane_roll(xc, d, roll_jnp), 0.0)
                        fut = jnp.where(fm, _lane_roll(xc, -d, roll_jnp), 0.0)
                    else:                      # side taps only ever read padding
                        past = jnp.zeros_like(xc)
                        fut = jnp.zeros_like(xc)
                    x3 = jnp.concatenate([past, xc, fut], axis=0)
                else:
                    # f32 roll/select, cast only the dot operand (v5e / f32 path).
                    if d < T:
                        pm, fm = tap_masks(d)
                        past = jnp.where(pm, _lane_roll(x, d, roll_jnp), 0.0)
                        fut = jnp.where(fm, _lane_roll(x, -d, roll_jnp), 0.0)
                    else:
                        past = jnp.zeros_like(x)
                        fut = jnp.zeros_like(x)
                    x3 = jnp.concatenate([past, x, fut], axis=0).astype(dot_dt)

                # One fused filter+gate matmul: (2Co, 3Co) @ (3Co, bt).
                fg = dot32(wfg_ref[i], x3) + bfg_ref[i]
                f = fg[:co]
                g = fg[co:]
                z = (jnp.tanh(f) * jax.nn.sigmoid(g)).astype(dot_dt)
                x = dot32(wc_ref[i], z) + bc_ref[i]    # 1x1 conv
                res = res + x
            x = res

        # Folded eval-mode BatchNorm + Linear(C -> 1):
        #   out = sum_C(res * (bn_scale * fc_w)) + (fc_b + sum_C(bn_shift * fc_w))
        out_ref[...] = (jnp.sum(x * scale_ref[...], axis=0, keepdims=True)
                        + const_ref[...])

    return kernel


# --------------------------- parameter preparation ------------------------------

def prepare_params(params, dot_dtype=DOT_DTYPE, keep_first_block_f32=True,
                   batch_grid=None):
    """Fuse filter/gate/tap weights, fold BN+fc head, pre-cast matmul operands."""
    is_v5, two_tc = _detect_tpu()
    if batch_grid is None:
        batch_grid = two_tc
    roll_jnp = _pltpu_roll_matches_jnp()
    req_dt = jnp.dtype(dot_dtype)

    arrays = []
    block_meta = []
    for bi, p in enumerate(params["blocks"]):
        dt = req_dt
        if keep_first_block_f32 and bi == 0 and req_dt == jnp.dtype(jnp.bfloat16):
            dt = jnp.dtype(jnp.float32)      # protect block 1's 12-step residual chain

        w0 = p["w0"][:, :, 0].astype(dt)                       # (Co, Cin)
        b0 = p["b0"][:, None].astype(jnp.float32)              # (Co, 1)

        # wf/wg: (R, Co_out, Co_in, K).  Fuse: taps along the contraction axis
        # (order [past, center, future] to match X3), filter/gate along rows.
        wf = p["wf"]
        wg = p["wg"]
        R, co, _, K = wf.shape
        wf_cat = jnp.transpose(wf, (0, 1, 3, 2)).reshape(R, co, K * co)
        wg_cat = jnp.transpose(wg, (0, 1, 3, 2)).reshape(R, co, K * co)
        wfg = jnp.concatenate([wf_cat, wg_cat], axis=1).astype(dt)        # (R, 2Co, 3Co)
        bfg = jnp.concatenate([p["bf"], p["bg"]], axis=1)[:, :, None].astype(jnp.float32)

        wc = p["wc"][:, :, :, 0].astype(dt)                    # (R, Co, Co)
        bc = p["bc"][:, :, None].astype(jnp.float32)           # (R, Co, 1)

        arrays += [w0, b0, wfg, bfg, wc, bc]
        ew_in_dot = (dt == jnp.dtype(jnp.bfloat16)) and (not is_v5)
        block_meta.append((tuple(int(v) for v in p["dilations"]), dt.name, ew_in_dot))

    # Fold BN (eval mode, running stats) and the fc head into scale' / const.
    bn = params["bn4"]
    inv = 1.0 / jnp.sqrt(bn["var"] + bn["eps"])
    scale = bn["gamma"] * inv
    shift = bn["beta"] - bn["mean"] * scale
    fcw = params["fc_w"].reshape(-1)                           # (C,)
    scale2 = (scale * fcw)[:, None].astype(jnp.float32)        # (C, 1)
    const = (params["fc_b"].reshape(()) + jnp.sum(shift * fcw)
             ).reshape(1, 1).astype(jnp.float32)               # (1, 1)
    arrays += [scale2, const]

    meta = {"blocks": tuple(block_meta), "roll_jnp": roll_jnp,
            "batch_grid": bool(batch_grid)}
    return {"arrays": tuple(arrays), "meta": meta}


# --------------------------------- forward --------------------------------------

def build_forward(prepped):
    """Returns a jitted fn (x, arrays) -> (B, T, 1) running the whole net in
    ONE pallas_call."""
    meta = prepped["meta"]
    block_meta = meta["blocks"]
    roll_jnp = meta["roll_jnp"]
    batch_grid = meta["batch_grid"]

    def fwd(x, arrays):
        B, T, Cin = x.shape
        h = jnp.transpose(x, (2, 0, 1)).reshape(Cin, B * T)   # lane l = b*T + t
        kernel = _make_classifier_kernel(block_meta, T, roll_jnp)
        out_shape = jax.ShapeDtypeStruct((1, B * T), jnp.float32)

        if batch_grid and B > 1:
            # v7x: one program per batch element, sharded across the 2 TCs.
            in_specs = [pl.BlockSpec((Cin, T), lambda b: (0, b))]
            for a in arrays:
                zeros = (0,) * a.ndim
                in_specs.append(pl.BlockSpec(a.shape, lambda b, _z=zeros: _z))
            y = pl.pallas_call(
                kernel,
                out_shape=out_shape,
                grid=(B,),
                in_specs=in_specs,
                out_specs=pl.BlockSpec((1, T), lambda b: (0, b)),
                compiler_params=pltpu.CompilerParams(
                    dimension_semantics=("parallel",)),
            )(h, *arrays)
        else:
            # v5e/v6e (1 TC): keep B folded into the lanes (full 256-wide MXU),
            # whole problem resident in VMEM, no grid.
            y = pl.pallas_call(kernel, out_shape=out_shape)(h, *arrays)

        return y.reshape(B, T)[..., None]

    return jax.jit(fwd)


# --------------------------- Pure-JAX reference ----------------------------------

def _conv1d_ref(x, w, b, dilation=1, padding=0):
    y = jax.lax.conv_general_dilated(
        x, w, window_strides=(1,), padding=[(padding, padding)],
        rhs_dilation=(dilation,), dimension_numbers=("NCH", "OIH", "NCH"),
        precision=jax.lax.Precision.HIGHEST)
    return y + b[None, :, None]


def _wave_block_reference(x, p, kernel_size=KERNEL_SIZE):
    x = _conv1d_ref(x, p["w0"], p["b0"])
    res = x
    for i, d in enumerate(p["dilations"]):
        pad = int(d * (kernel_size - 1) / 2)
        z = (jnp.tanh(_conv1d_ref(x, p["wf"][i], p["bf"][i], d, pad)) *
             jax.nn.sigmoid(_conv1d_ref(x, p["wg"][i], p["bg"][i], d, pad)))
        x = _conv1d_ref(z, p["wc"][i], p["bc"][i])
        res = res + x
    return res


def classifier_reference(x, params):
    x = jnp.transpose(x, (0, 2, 1))
    for p in params["blocks"]:
        x = _wave_block_reference(x, p)
    bn = params["bn4"]
    xbn = ((x - bn["mean"][None, :, None]) /
           jnp.sqrt(bn["var"][None, :, None] + bn["eps"]) *
           bn["gamma"][None, :, None] + bn["beta"][None, :, None])
    xbn = jnp.transpose(xbn, (0, 2, 1))                     # (B, T, C)
    y = jnp.einsum("btc,oc->bto", xbn, params["fc_w"],
                   precision=jax.lax.Precision.HIGHEST) + params["fc_b"]
    return y


# --------------------------- Deterministic init ----------------------------------

def init_wave_block(key, cin, cout, num_rates, k=KERNEL_SIZE):
    keys = jax.random.split(key, 8)

    def u(kk, shape, fan_in):
        bound = 1.0 / (fan_in ** 0.5)
        return jax.random.uniform(kk, shape, jnp.float32, -bound, bound)

    return {
        "w0": u(keys[0], (cout, cin, 1), cin),
        "b0": u(keys[1], (cout,), cin),
        "wf": u(keys[2], (num_rates, cout, cout, k), cout * k),
        "bf": u(keys[3], (num_rates, cout), cout * k),
        "wg": u(keys[4], (num_rates, cout, cout, k), cout * k),
        "bg": u(keys[5], (num_rates, cout), cout * k),
        "wc": u(keys[6], (num_rates, cout, cout, 1), cout),
        "bc": u(keys[7], (num_rates, cout), cout),
        "dilations": [2 ** i for i in range(num_rates)],
    }


def init_classifier(key, inch=8, kernel_size=KERNEL_SIZE):
    keys = jax.random.split(key, 7)
    specs = [(inch, 16, 12), (16, 32, 8), (32, 64, 4), (64, 128, 1)]
    blocks = [init_wave_block(keys[i], cin, cout, r, kernel_size)
              for i, (cin, cout, r) in enumerate(specs)]
    fc_bound = 1.0 / (128 ** 0.5)
    fc_w = jax.random.uniform(keys[4], (1, 128), jnp.float32, -fc_bound, fc_bound)
    fc_b = jax.random.uniform(keys[5], (1,), jnp.float32, -fc_bound, fc_bound)
    bnk = jax.random.split(keys[6], 4)
    bn4 = {
        "gamma": 1.0 + 0.1 * jax.random.normal(bnk[0], (128,), jnp.float32),
        "beta": 0.1 * jax.random.normal(bnk[1], (128,), jnp.float32),
        "mean": 0.1 * jax.random.normal(bnk[2], (128,), jnp.float32),
        "var": 1.0 + 0.1 * jax.random.uniform(bnk[3], (128,), jnp.float32),
        "eps": 1e-5,
    }
    return {"blocks": blocks, "fc_w": fc_w, "fc_b": fc_b, "bn4": bn4}


# --------------------------------- Main -------------------------------------------

if __name__ == "__main__":
    key = jax.random.PRNGKey(0)
    pkey, xkey = jax.random.split(key)
    params = init_classifier(pkey, inch=8)

    B, T, Cin = 2, 128, 8
    x = jax.random.normal(xkey, (B, T, Cin), jnp.float32)

    ref = jax.block_until_ready(classifier_reference(x, params))

    # f32-operand MXU path: tight structural check against the XLA reference.
    prepped_f32 = prepare_params(params, jnp.float32)
    fwd_f32 = build_forward(prepped_f32)
    out_f32 = jax.block_until_ready(fwd_f32(x, prepped_f32["arrays"]))
    assert out_f32.shape == (B, T, 1), out_f32.shape
    err_f32 = float(jnp.max(jnp.abs(out_f32 - ref)))
    assert err_f32 < 1e-2, f"f32 path: max abs err vs reference: {err_f32}"

    # Default perf path: block 1 f32 operands, blocks 2-4 bf16 operands with
    # f32 accumulation; rolls/selects in bf16 on chips with a bf16 VPU.
    prepped = prepare_params(params)
    fwd = build_forward(prepped)
    out = jax.block_until_ready(fwd(x, prepped["arrays"]))
    assert out.shape == (B, T, 1), out.shape
    err = float(jnp.max(jnp.abs(out - ref)))
    assert err < 1e-1, f"perf path: max abs err vs reference: {err}"

    print("KERNEL_OK")
</pallas_src>

<mosaic_0001>
module attributes {stable_mosaic.version = 11 : i64} {
  func.func @_roll_probe_kernel(%arg0: memref<8x128xf32, #tpu.memory_space<vmem>>, %arg1: memref<8x128xf32, #tpu.memory_space<vmem>>) attributes {dimension_semantics = [], scalar_prefetch = 0 : i64, scratch_operands = 0 : i64, tpu.core_type = #tpu.core_type<tc>} {
    %c0 = arith.constant 0 : index
    %c0_0 = arith.constant 0 : index
    %0 = vector.load %arg0[%c0, %c0_0] : memref<8x128xf32, #tpu.memory_space<vmem>>, vector<8x128xf32>
    %c1_i32 = arith.constant 1 : i32
    %1 = tpu.dynamic_rotate %0 by %c1_i32 dim 1 : vector<8x128xf32>, i32 -> vector<8x128xf32>
    %c0_1 = arith.constant 0 : index
    %c0_2 = arith.constant 0 : index
    %2 = vector.load %arg1[%c0_1, %c0_2] : memref<8x128xf32, #tpu.memory_space<vmem>>, vector<8x128xf32>
    tpu.vector_store %arg1[%c0_1, %c0_2], %1 {strides = array<i32>} : memref<8x128xf32, #tpu.memory_space<vmem>>, vector<8x128xf32>,
    return
  }
}

</mosaic_0001>

<bundles_post_ra>
// kernel: tpu_custom_call.1
= control target key start
LH: loop header
LB: loop body
LE: loop exit
PB: predicated region body
PF: predicated region fallthrough
CT: control target
= control target key end

     0   :  { %6 = vsyncpa [#allocation3], 0  ;;  %s118_s0 = inlined_call_operand.hbm [shape: f32[8,128], index: 0, kind: input, shape index: {}]   ;;  %s119_s1 = inlined_call_operand.hbm [shape: f32[8,128], index: 1, kind: output, shape index: {}]  }
   0x1   :  { %7 = vsyncpa [#allocation4], 0  ;;  %s13_s8 = sshll.u32 %s118_s0, 4  ;;  %s99_s9 = smov [#allocation2]   ;;  %s14_s8 = int_to_ptr.hbm [resolvable:$true] %s13_s8 }
   0x2   :  { %s15_s10 = sshll.u32 %s99_s9, 4  ;;  %s16_s10 = int_to_ptr.vmem [resolvable:$true] %s15_s10 }
   0x3   :  { %18 = dma.hbm_to_vmem [thread:$0]  %s14_s8, 128, %s16_s10, [#allocation3]  }
   0x4   :  { %95 = dma.done.wait [#allocation3], 128  }
   0x5   :  { %96 = vsyncadd [#allocation3], 4294967168  ;;  %v23_v0 = vld [vmem:[#allocation2] sm:$0xff]  ;;  %s100_s11 = smov 1   ;;  %s101_s12 = smov [#allocation5]  }
   0x6   :  { %24 = vrot.lane.b32.xlu0 %v23_v0, %s100_s11  ;;  %s32_s13 = sshll.u32 %s101_s12, 4  ;;  %s34_s16 = sshll.u32 %s119_s1, 4  ;;  %s33_s13 = int_to_ptr.vmem [resolvable:$true] %s32_s13  ;;  %s35_s16 = int_to_ptr.hbm [resolvable:$true] %s34_s16 }
  0x78   :  { %v25_v1 = vpop.permute.xlu0 %24 }
  0x79   :  { %26 = vst [vmem:[#allocation5] sm:$0xff] %v25_v1 }
  0x7a   :  { %37 = dma.vmem_to_hbm [thread:$0]  %s33_s13, 128, %s35_s16, [#allocation4]  }
  0x7b   :  { %97 = dma.done.wait [#allocation4], 128  }
  0x7c   :  { %98 = vsyncadd [#allocation4], 4294967168 }
  0x7d   :  { %42 = vsyncpa [#allocation3], 1 }
  0x7e   :  { %43 = vsyncpa [#allocation4], 1 }

</bundles_post_ra>
